<compile_context>
chip_gen: v7x
topology: tpu7x:2x2x1
jax: 0.10.0
libtpu: 0.0.40
codegen_flags: <defaults>
</compile_context>

<pallas_src>
import functools

import numpy as np
import jax
import jax.numpy as jnp
from jax.experimental import pallas as pl
from jax.experimental.pallas import tpu as pltpu

_LANES = 128


def _cdiv(a, b):
    return -(-a // b)


def _sublane_multiple(dtype):
    itemsize = jnp.dtype(dtype).itemsize
    return 8 * max(1, 4 // itemsize)


def _soft_dice_partial_kernel(logits_ref, targets_ref, inter_ref, denom_ref, *,
                              valid_elems, chunk_elems, ragged):
    """Grid = (sample, chunk).  Emit one partial (inter, denom) pair per step."""
    p = jax.nn.sigmoid(logits_ref[...].astype(jnp.float32))   # EUP slot
    t = targets_ref[...].astype(jnp.float32)

    if ragged:
        # Zero out the tail of the last chunk: undefined rows of the final
        # (boundary-padded) block and the <128-element lane tail.  Only emitted
        # when the feature count doesn't divide the tiling exactly.
        j = pl.program_id(1)
        rem = valid_elems - j * chunk_elems        # >= chunk_elems for non-last chunks
        rows, lanes = p.shape
        flat = (jax.lax.broadcasted_iota(jnp.int32, (rows, lanes), 0) * lanes
                + jax.lax.broadcasted_iota(jnp.int32, (rows, lanes), 1))
        valid = flat < rem
        p = jnp.where(valid, p, 0.0)
        t = jnp.where(valid, t, 0.0)

    inter = jnp.sum(p * t)                         # VPU adds + one XLU reduce
    denom = jnp.sum(p + t)
    inter_ref[...] = jnp.full(inter_ref.shape, inter, dtype=inter_ref.dtype)
    denom_ref[...] = jnp.full(denom_ref.shape, denom, dtype=denom_ref.dtype)


def soft_dice_loss(logits, targets, *, max_rows_per_block=8192):
    """logits, targets: arrays of identical shape (N, ...). Returns scalar loss."""
    assert logits.shape == targets.shape, "logits/targets must have the same shape"
    n = logits.shape[0]
    d = int(np.prod(logits.shape[1:]))

    # --- tile geometry --------------------------------------------------------
    r = _cdiv(d, _LANES)                                     # lane-rows per sample
    sub = max(_sublane_multiple(logits.dtype), _sublane_multiple(targets.dtype))
    num_chunks = max(1, _cdiv(r, max_rows_per_block))
    rows_tile = _cdiv(_cdiv(r, num_chunks), sub) * sub        # packed-sublane aligned
    num_chunks = _cdiv(r, rows_tile)                          # ragged last chunk is OK
    chunk_elems = rows_tile * _LANES
    ragged = (d != num_chunks * chunk_elems)

    logits2d = logits.reshape(n, d)
    targets2d = targets.reshape(n, d)
    d_lane = r * _LANES
    if d_lane != d:
        # Minimal (<128 elems per sample) pad so the lane-dense (R, 128) view
        # exists; the pad values are irrelevant -- the in-kernel mask zeroes them.
        pad = d_lane - d
        logits2d = jnp.pad(logits2d, ((0, 0), (0, pad)))
        targets2d = jnp.pad(targets2d, ((0, 0), (0, pad)))
    logits3d = logits2d.reshape(n, r, _LANES)                 # free reshape
    targets3d = targets2d.reshape(n, r, _LANES)

    out_rows = 8                                              # lane-dense (8,128) partials
    partial_shape = (n, num_chunks, out_rows, _LANES)
    bytes_accessed = int(
        n * d * (jnp.dtype(logits.dtype).itemsize + jnp.dtype(targets.dtype).itemsize)
        + 2 * int(np.prod(partial_shape)) * 4)
    cost = pl.CostEstimate(flops=4 * n * d, transcendentals=n * d,
                           bytes_accessed=bytes_accessed)

    kernel = functools.partial(_soft_dice_partial_kernel,
                               valid_elems=d, chunk_elems=chunk_elems,
                               ragged=ragged)

    inter_p, denom_p = pl.pallas_call(
        kernel,
        out_shape=(jax.ShapeDtypeStruct(partial_shape, jnp.float32),
                   jax.ShapeDtypeStruct(partial_shape, jnp.float32)),
        grid_spec=pltpu.PrefetchScalarGridSpec(
            num_scalar_prefetch=0,
            grid=(n, num_chunks),
            in_specs=[
                pl.BlockSpec((None, rows_tile, _LANES), lambda i, j: (i, j, 0)),
                pl.BlockSpec((None, rows_tile, _LANES), lambda i, j: (i, j, 0)),
            ],
            out_specs=(
                pl.BlockSpec((None, None, out_rows, _LANES), lambda i, j: (i, j, 0, 0)),
                pl.BlockSpec((None, None, out_rows, _LANES), lambda i, j: (i, j, 0, 0)),
            ),
        ),
        compiler_params=pltpu.CompilerParams(
            dimension_semantics=("parallel", "parallel"),
            vmem_limit_bytes=32 * 1024 * 1024,
        ),
        cost_estimate=cost,
    )(logits3d, targets3d)

    smooth = 1.0
    inter = jnp.sum(inter_p[:, :, 0, 0], axis=1)              # (N,)
    denom = jnp.sum(denom_p[:, :, 0, 0], axis=1)              # (N,)
    score = 2.0 * (inter + smooth) / (denom + smooth)
    return 1.0 - jnp.sum(score) / n


def _reference_soft_dice_loss(logits, targets):
    n = logits.shape[0]
    smooth = 1.0
    probs = jax.nn.sigmoid(logits.astype(jnp.float32)).reshape(n, -1)
    m2 = targets.astype(jnp.float32).reshape(n, -1)
    inter = jnp.sum(probs * m2, axis=1)
    score = 2.0 * (inter + smooth) / (jnp.sum(probs, 1) + jnp.sum(m2, 1) + smooth)
    return 1.0 - jnp.sum(score) / n


if __name__ == "__main__":
    key = jax.random.PRNGKey(0)
    k1, k2, k3, k4, k5, k6 = jax.random.split(key, 6)

    # 1) Small NCHW case from the module spec (D = 1024, exactly tile-aligned:
    #    single chunk, mask path not even emitted).
    N, C, H, W = 2, 4, 16, 16
    logits = jax.random.normal(k1, (N, C, H, W), dtype=jnp.float32)
    targets = (jax.random.uniform(k2, (N, C, H, W)) > 0.5).astype(jnp.float32)
    loss = jax.block_until_ready(soft_dice_loss(logits, targets))
    ref = jax.block_until_ready(_reference_soft_dice_loss(logits, targets))
    np.testing.assert_allclose(np.asarray(loss), np.asarray(ref), rtol=1e-5, atol=1e-5)

    # 2) D = 40000: not a multiple of 128 (64-element lane tail) and, with small
    #    blocks, multiple ragged chunks per sample -> exercises the in-kernel
    #    mask and the chunk-parallel partial-sum path.
    N2, C2, H2, W2 = 2, 4, 100, 100
    logits2 = jax.random.normal(k3, (N2, C2, H2, W2), dtype=jnp.float32)
    targets2 = (jax.random.uniform(k4, (N2, C2, H2, W2)) > 0.5).astype(jnp.float32)
    loss2 = jax.block_until_ready(soft_dice_loss(logits2, targets2, max_rows_per_block=64))
    ref2 = jax.block_until_ready(_reference_soft_dice_loss(logits2, targets2))
    np.testing.assert_allclose(np.asarray(loss2), np.asarray(ref2), rtol=1e-5, atol=1e-5)

    # 3) bf16 inputs (halves HBM traffic); rows_tile rounds to the 16-row
    #    packed-sublane multiple so blocks stay copy-free.
    N3, C3, H3, W3 = 2, 4, 32, 32
    logits3 = jax.random.normal(k5, (N3, C3, H3, W3), dtype=jnp.bfloat16)
    targets3 = (jax.random.uniform(k6, (N3, C3, H3, W3)) > 0.5).astype(jnp.bfloat16)
    loss3 = jax.block_until_ready(soft_dice_loss(logits3, targets3))
    ref3 = jax.block_until_ready(_reference_soft_dice_loss(logits3, targets3))
    np.testing.assert_allclose(np.asarray(loss3), np.asarray(ref3), rtol=1e-5, atol=1e-5)

    print("KERNEL_OK")
</pallas_src>

<mosaic_0001>
module attributes {stable_mosaic.version = 11 : i64} {
  func.func @_soft_dice_partial_kernel(%arg0: i32, %arg1: i32, %arg2: memref<1x8x128xf32, #tpu.memory_space<vmem>>, %arg3: memref<1x8x128xf32, #tpu.memory_space<vmem>>, %arg4: memref<1x1x8x128xf32, #tpu.memory_space<vmem>>, %arg5: memref<1x1x8x128xf32, #tpu.memory_space<vmem>>) attributes {dimension_semantics = [#tpu.dimension_semantics<parallel>, #tpu.dimension_semantics<parallel>], iteration_bounds = array<i64: 2, 1>, scalar_prefetch = 0 : i64, scratch_operands = 0 : i64, tpu.core_type = #tpu.core_type<tc>, window_params = [{transform_indices = @transform_0, window_bounds = array<i64: 1, 8, 128>}, {transform_indices = @transform_1, window_bounds = array<i64: 1, 8, 128>}, {transform_indices = @transform_2, window_bounds = array<i64: 1, 1, 8, 128>}, {transform_indices = @transform_3, window_bounds = array<i64: 1, 1, 8, 128>}]} {
    %c0 = arith.constant 0 : index
    %c0_0 = arith.constant 0 : index
    %c0_1 = arith.constant 0 : index
    %0 = vector.load %arg2[%c0, %c0_0, %c0_1] : memref<1x8x128xf32, #tpu.memory_space<vmem>>, vector<1x8x128xf32>
    %1 = vector.shape_cast %0 : vector<1x8x128xf32> to vector<8x128xf32>
    %2 = arith.negf %1 : vector<8x128xf32>
    %3 = math.exp %2 : vector<8x128xf32>
    %cst = arith.constant 1.000000e+00 : f32
    %4 = vector.broadcast %cst : f32 to vector<8x128xf32>
    %5 = arith.addf %4, %3 : vector<8x128xf32>
    %6 = arith.divf %4, %5 : vector<8x128xf32>
    %c0_2 = arith.constant 0 : index
    %c0_3 = arith.constant 0 : index
    %c0_4 = arith.constant 0 : index
    %7 = vector.load %arg3[%c0_2, %c0_3, %c0_4] : memref<1x8x128xf32, #tpu.memory_space<vmem>>, vector<1x8x128xf32>
    %8 = vector.shape_cast %7 : vector<1x8x128xf32> to vector<8x128xf32>
    %9 = arith.mulf %6, %8 : vector<8x128xf32>
    %10 = vector.shape_cast %9 : vector<8x128xf32> to vector<1x8x128xf32>
    %cst_5 = arith.constant dense<0.000000e+00> : vector<1xf32>
    %11 = vector.multi_reduction <add>, %10, %cst_5 [1, 2] : vector<1x8x128xf32> to vector<1xf32>
    %12 = vector.shape_cast %11 : vector<1xf32> to vector<1x1x1xf32>
    %13 = vector.extract %12[0, 0, 0] : f32 from vector<1x1x1xf32>
    %14 = arith.addf %6, %8 : vector<8x128xf32>
    %15 = vector.shape_cast %14 : vector<8x128xf32> to vector<1x8x128xf32>
    %cst_6 = arith.constant dense<0.000000e+00> : vector<1xf32>
    %16 = vector.multi_reduction <add>, %15, %cst_6 [1, 2] : vector<1x8x128xf32> to vector<1xf32>
    %17 = vector.shape_cast %16 : vector<1xf32> to vector<1x1x1xf32>
    %18 = vector.extract %17[0, 0, 0] : f32 from vector<1x1x1xf32>
    %19 = vector.broadcast %13 : f32 to vector<8x128xf32>
    %c0_7 = arith.constant 0 : index
    %c0_8 = arith.constant 0 : index
    %c0_9 = arith.constant 0 : index
    %c0_10 = arith.constant 0 : index
    %20 = vector.load %arg4[%c0_7, %c0_8, %c0_9, %c0_10] : memref<1x1x8x128xf32, #tpu.memory_space<vmem>>, vector<1x1x8x128xf32>
    %21 = vector.shape_cast %20 : vector<1x1x8x128xf32> to vector<8x128xf32>
    %22 = vector.shape_cast %19 : vector<8x128xf32> to vector<1x1x8x128xf32>
    tpu.vector_store %arg4[%c0_7, %c0_8, %c0_9, %c0_10], %22 {strides = array<i32>} : memref<1x1x8x128xf32, #tpu.memory_space<vmem>>, vector<1x1x8x128xf32>,
    %23 = vector.broadcast %18 : f32 to vector<8x128xf32>
    %c0_11 = arith.constant 0 : index
    %c0_12 = arith.constant 0 : index
    %c0_13 = arith.constant 0 : index
    %c0_14 = arith.constant 0 : index
    %24 = vector.load %arg5[%c0_11, %c0_12, %c0_13, %c0_14] : memref<1x1x8x128xf32, #tpu.memory_space<vmem>>, vector<1x1x8x128xf32>
    %25 = vector.shape_cast %24 : vector<1x1x8x128xf32> to vector<8x128xf32>
    %26 = vector.shape_cast %23 : vector<8x128xf32> to vector<1x1x8x128xf32>
    tpu.vector_store %arg5[%c0_11, %c0_12, %c0_13, %c0_14], %26 {strides = array<i32>} : memref<1x1x8x128xf32, #tpu.memory_space<vmem>>, vector<1x1x8x128xf32>,
    return
  }
  func.func @transform_0(%arg0: i32, %arg1: i32) -> (i32, i32, i32) {
    %c0_i32 = arith.constant 0 : i32
    %c0_i32_0 = arith.constant 0 : i32
    return %arg0, %arg1, %c0_i32 : i32, i32, i32
  }
  func.func @transform_1(%arg0: i32, %arg1: i32) -> (i32, i32, i32) {
    %c0_i32 = arith.constant 0 : i32
    %c0_i32_0 = arith.constant 0 : i32
    return %arg0, %arg1, %c0_i32 : i32, i32, i32
  }
  func.func @transform_2(%arg0: i32, %arg1: i32) -> (i32, i32, i32, i32) {
    %c0_i32 = arith.constant 0 : i32
    %c0_i32_0 = arith.constant 0 : i32
    %c0_i32_1 = arith.constant 0 : i32
    return %arg0, %arg1, %c0_i32, %c0_i32_0 : i32, i32, i32, i32
  }
  func.func @transform_3(%arg0: i32, %arg1: i32) -> (i32, i32, i32, i32) {
    %c0_i32 = arith.constant 0 : i32
    %c0_i32_0 = arith.constant 0 : i32
    %c0_i32_1 = arith.constant 0 : i32
    return %arg0, %arg1, %c0_i32, %c0_i32_0 : i32, i32, i32, i32
  }
}

</mosaic_0001>

<bundles_post_ra>
// kernel: tpu_custom_call.1
= control target key start
LH: loop header
LB: loop body
LE: loop exit
PB: predicated region body
PF: predicated region fallthrough
CT: control target
= control target key end

     0   :  { %9 = vsyncpa [#allocation3], 0  ;;  %s1026_s0 = inlined_call_operand.hbm [shape: f32[2,8,128], index: 0, kind: input, shape index: {}]   ;;  %s1027_s1 = inlined_call_operand.hbm [shape: f32[2,8,128], index: 1, kind: input, shape index: {}]   ;;  %s1028_s2 = inlined_call_operand.hbm [shape: f32[2,1,8,128], index: 2, kind: output, shape index: {0}]   ;;  %s1029_s3 = inlined_call_operand.hbm [shape: f32[2,1,8,128], index: 3, kind: output, shape index: {1}]  }
   0x1   :  { %11 = vsyncpa [#allocation3 + $0x1], 0 }
   0x2   :  { %12 = vsyncpa [#allocation6], 0 }
   0x3   :  { %14 = vsyncpa [#allocation6 + $0x1], 0 }
   0x4   :  { %15 = vsyncpa [#allocation4], 0 }
   0x5   :  { %17 = vsyncpa [#allocation4 + $0x1], 0 }
   0x6   :  { %18 = vsyncpa [#allocation9], 0 }
   0x7   :  { %20 = vsyncpa [#allocation9 + $0x1], 0  ;;  %s763_s12 = smov 0   ;;  %s765_s13 = smov 0  }
   0x8   :  { %s767_s14 = smov 0   ;;  %s769_s15 = smov 0  }
   0x9   :  { %s771_s16 = smov 0   ;;  %s773_s17 = smov 0  }
   0xa LB: > { %s459_s18 = sadd.s32 4294967295, %s737_s17   ;;  %s460_s19 = sadd.s32 4294967294, %s737_s17   ;;  %s737_s17 = sphi %s773_s17, %s26_s17   ;;  %s733_s16 = sphi %s771_s16, %s1049_s16   ;;  %s729_s15 = sphi %s769_s15, %s1048_s15   ;;  %s725_s14 = sphi %s767_s14, %s1047_s14   ;;  %s721_s13 = sphi %s765_s13, %s1046_s13   ;;  %s717_s12 = sphi %s763_s12, %s1045_s12  }
   0xb   : > { %s38_s20 = sadd.s32 1, %s733_s16  ;;  %s47_s21 = sadd.s32 1, %s725_s14 }
   0xc   : > { %p40_p0 = scmp.ge.s32.totalorder %s38_s20, 2  ;;  %p54_p1 = scmp.ne.s32.totalorder %s725_s14, %s721_s13 }
   0xd   : > { %p55_p2 = scmp.eq.s32.totalorder %s737_s17, 0  ;;  %p60_p3 = scmp.ne.s32.totalorder %s721_s13, %s717_s12 }
   0xe   : > { %s1051_s20 = smov (%p40_p0, %s38_s20), 0  ;;  %p61_p5 = scmp.eq.s32.totalorder %s459_s18, 0 }
   0xf   : > { %p804_p4 = por %p55_p2, %p54_p1  ;;  %s42_s23 = ssub.s32 %s733_s16, %s1051_s20 }
  0x10   : > { %p114_p6 = scmp.eq.s32.totalorder %s459_s18, 1  ;;  %p45_p7 = scmp.eq.s32.totalorder %s42_s23, 0 }
  0x11   : > { %p810_p8 = por %p61_p5, %p60_p3  ;;  %p120_p10 = scmp.eq.s32.totalorder %s460_s19, 1 }
  0x12   : > { %p814_p9 = por %p114_p6, %p54_p1  ;;  %p505_p13 = scmp.lt.s32.totalorder %s737_s17, 2 }
  0x13   : > { %s1033_s24 = scalar_select %p810_p8, 1, 0 }
  0x14   : > { %s1034_s25 = scalar_select %p814_p9, 1, 0 }
  0x15   : > { %s819_s26 = scalar_select %p45_p7, %s725_s14, %s47_s21  }
  0x16   : > { %p821_p11 = por %p120_p10, %p60_p3  ;;  %s828_s28 = sand.u32 1, %s725_s14  }
  0x17   : > { %s463_s29 = sshll.u32 %s828_s28, 3  ;;  %s464_s30 = sshll.u32 %s733_s16, 7 }
  0x18   : > { %s1035_s27 = scalar_select %p821_p11, 1, 0 }
  0x19   : > { %s837_s6 = scalar_lea.hbm %s1026_s0, %s464_s30  ;;  %s172_s7 = scalar_lea.vmem [#allocation2], %s463_s29 }
  0x1a   : > { %s180_s8 = sshll.u32 %s172_s7, 4  ;;  %p845_p0 = pnand %p505_p13, %p804_p4  ;;  %s841_s8 = int_to_ptr.vmem [resolvable:$true] %s180_s8 }
  0x1b   : > { %s169_s10 = scalar_lea.sflag [#allocation3], %s828_s28  ;;  %s559_s11 = scalar_lea.hbm %s837_s6, 128 }
  0x1c   : > { %p560_p3 = scmp.ne.s32.totalorder %s837_s6, %s559_s11  ;;  %p561_p5 = pneg %p845_p0 }
  0x1d   : > { %s564_s21 = scalar_lea.hbm %s1026_s0, 256  ;;  %p565_p4 = scmp.lt.u32.totalorder %s837_s6, %s1026_s0 }
  0x1e   : > { %p562_p6 = pnand %p561_p5, %p560_p3  ;;  %p566_p10 = scmp.lt.u32.totalorder %s564_s21, %s559_s11 }
  0x1f   : > { %p568_p12 = scmp.lt.u32.totalorder %s559_s11, %s837_s6 }
  0x20   : > { %p563_p7 = pneg %p562_p6  ;;  %p567_p13 = por %p566_p10, %p565_p4 }
  0x22   : > { %p569_p1 = por %p568_p12, %p567_p13 }
  0x24   : > { %p570_p2 = pnand %p569_p1, %p563_p7 }
  0x26   : > { %573 = shalt.err (!%p570_p2)
}
  0x27   : > { %s574_s4 = scalar_lea.vmem %s841_s8, 128  ;;  %s739_s5 = smov [#allocation2]  }
  0x28   : > { %p575_p3 = scmp.ne.s32.totalorder %s841_s8, %s574_s4  ;;  %s579_s7 = sshll.u32 %s739_s5, 4  ;;  %s580_s7 = int_to_ptr.vmem [resolvable:$false] %s579_s7 }
  0x29   : > { %s581_s18 = scalar_lea.vmem %s580_s7, 256  ;;  %p582_p9 = scmp.lt.s32.totalorder %s841_s8, %s580_s7 }
  0x2a   : > { %p577_p6 = pnand %p575_p3, %p561_p5  ;;  %p583_p4 = scmp.lt.s32.totalorder %s581_s18, %s574_s4 }
  0x2c   : > { %p578_p11 = pneg %p577_p6  ;;  %p584_p10 = por %p583_p4, %p582_p9 }
  0x2e   : > { %p585_p12 = pnand %p584_p10, %p578_p11 }
  0x30   : > { %588 = shalt.err (!%p585_p12)
}
  0x31   : > { %494 = dma.hbm_to_vmem [thread:$0]  (!%p845_p0), %s837_s6, 128, %s841_s8, %s169_s10  }
  0x32   : > { %p1037_p1 = scmp.lt.s32.totalorder %s737_s17, 3  ;;  %p1038_p2 = scmp.ge.s32.totalorder %s737_s17, 1 }
  0x33   : > { %s890_s22 = scalar_lea.hbm %s1027_s1, %s464_s30  ;;  %s191_s23 = scalar_lea.vmem [#allocation5], %s463_s29 }
  0x34   : > { %p881_p7 = pnand %p1038_p2, %p1037_p1  ;;  %s199_s4 = sshll.u32 %s191_s23, 4  ;;  %s200_s4 = int_to_ptr.vmem [resolvable:$true] %s199_s4 }
  0x35   : > { %s188_s6 = scalar_lea.sflag [#allocation6], %s828_s28  ;;  %s589_s8 = scalar_lea.hbm %s890_s22, 128 }
  0x36   : > { %s1039_s11 = scalar_select %p881_p7, 1, 0 }
  0x37   : > { %p590_p9 = scmp.ne.s32.totalorder %s890_s22, %s589_s8  ;;  %s594_s30 = scalar_lea.hbm %s1027_s1, 256 }
  0x38   : > { %p595_p3 = scmp.lt.u32.totalorder %s890_s22, %s1027_s1  ;;  %p596_p6 = scmp.lt.u32.totalorder %s594_s30, %s589_s8 }
  0x39   : > { %p592_p11 = pnand %p590_p9, %p561_p5  ;;  %p598_p10 = scmp.lt.u32.totalorder %s589_s8, %s890_s22 }
  0x3a   : > { %p597_p4 = por %p596_p6, %p595_p3 }
  0x3b   : > { %p593_p13 = pneg %p592_p11 }
  0x3c   : > { %p599_p12 = por %p598_p10, %p597_p4 }
  0x3e   : > { %p600_p1 = pnand %p599_p12, %p593_p13 }
  0x40   : > { %603 = shalt.err (!%p600_p1)
}
  0x41   : > { %s604_s28 = scalar_lea.vmem %s200_s4, 128  ;;  %s740_s29 = smov [#allocation5]  }
  0x42   : > { %p605_p2 = scmp.ne.s32.totalorder %s200_s4, %s604_s28  ;;  %s609_s19 = sshll.u32 %s740_s29, 4  ;;  %s610_s19 = int_to_ptr.vmem [resolvable:$false] %s609_s19 }
  0x43   : > { %s611_s21 = scalar_lea.vmem %s610_s19, 256  ;;  %p612_p8 = scmp.lt.s32.totalorder %s200_s4, %s610_s19 }
  0x44   : > { %p607_p9 = pnand %p605_p2, %p561_p5  ;;  %p613_p7 = scmp.lt.s32.totalorder %s611_s21, %s604_s28 }
  0x46   : > { %p608_p11 = pneg %p607_p9  ;;  %p614_p3 = por %p613_p7, %p612_p8 }
  0x48   : > { %p615_p6 = pnand %p614_p3, %p608_p11 }
  0x4a   : > { %618 = shalt.err (!%p615_p6)
}
  0x4b   : > { %497 = dma.hbm_to_vmem [thread:$0]  (!%p845_p0), %s890_s22, 128, %s200_s4, %s188_s6  }
  0x4c   : > { %p1040_p13 = scmp.ne.s32.totalorder %s1039_s11, 0 }
  0x4d   : > { %s917_s23 = sand.u32 (!%p1040_p13), 1, %s721_s13   ;;  %p1041_p8 = scmp.ne.s32.totalorder (!%p1040_p13), %s1033_s24, 0 }
  0x4e   : > { %208 = sbr.rel (%p1040_p13) target bundleno = 360 (0x168), region = 28  ;;  %s920_s8 = sshll.u32 (!%p1040_p13), %s917_s23, 3 }
  0x4f   : > { %s211_s10 = scalar_lea.sflag (!%p1040_p13), [#allocation3], %s917_s23  ;;  %s214_s5 = scalar_lea.vmem (!%p1040_p13), [#allocation2], %s920_s8 }
  0x55   : > { %700 = dma.done.wait (%p1041_p8), %s211_s10, 128  }
  0x56   : > { %702 = vsyncadd (%p1041_p8), %s211_s10, 4294967168  ;;  %s220_s9 = scalar_lea.sflag [#allocation6], %s917_s23  ;;  %s223_s11 = scalar_lea.vmem [#allocation5], %s920_s8 }
  0x57   : > { %704 = dma.done.wait (%p1041_p8), %s220_s9, 128  }
  0x58   : > { %706 = vsyncadd (%p1041_p8), %s220_s9, 4294967168  ;;  %v256_v0 = vld [vmem:[%s214_s5] sm:$0xff]  ;;  %v263_v4 = vld [vmem:[%s223_s11] sm:$0xff]  ;;  %s475_s24 = sshll.u32 %s729_s15, 7  ;;  %s248_s22 = scalar_lea.vmem [#allocation7], %s920_s8 }
  0x59   : > { %v472_v1 = vmul.f32 -1.442695, %v256_v0  ;;  %s308_s4 = sshll.u32 %s248_s22, 4  ;;  %s255_s6 = scalar_lea.vmem [#allocation8], %s920_s8  ;;  %s946_s4 = int_to_ptr.vmem [resolvable:$true] %s308_s4 }
  0x5a   : > { %s322_s30 = sshll.u32 %s255_s6, 4  ;;  %s944_s28 = scalar_lea.hbm %s1028_s2, %s475_s24  ;;  %s948_s30 = int_to_ptr.vmem [resolvable:$true] %s322_s30 }
  0x5b   : > { %555 = vpow2.f32 %v472_v1  ;;  %s289_s19 = scalar_lea.sflag [#allocation4], %s917_s23  ;;  %s619_s21 = scalar_lea.vmem %s946_s4, 128 }
  0x5c   : > { %p620_p0 = scmp.ne.s32.totalorder %s946_s4, %s619_s21  ;;  %p1042_p5 = scmp.ne.s32.totalorder %s1034_s25, 0 }
  0x5d   : > { %s741_s10 = smov [#allocation7]  }
  0x5e   : > { %p621_p7 = pnand %p620_p0, %p1042_p5  ;;  %s623_s5 = sshll.u32 %s741_s10, 4  ;;  %s624_s5 = int_to_ptr.vmem [resolvable:$false] %s623_s5 }
  0x5f   : > { %s625_s9 = scalar_lea.vmem %s624_s5, 256  ;;  %p626_p10 = scmp.lt.s32.totalorder %s946_s4, %s624_s5 }
  0x60   : > { %p622_p4 = pneg %p621_p7  ;;  %p627_p12 = scmp.lt.s32.totalorder %s625_s9, %s619_s21 }
  0x62   : > { %p628_p1 = por %p627_p12, %p626_p10 }
  0x64   : > { %p629_p2 = pnand %p628_p1, %p622_p4 }
  0x65   : > { %v556_v2 = vpop.eup %555 }
  0x66   : > { %v260_v3 = vadd.f32 1.0, %v556_v2 }
  0x68   : > { %557 = vrcp.f32 %v260_v3 }
  0x72   : > { %v558_v5 = vpop.eup %557 }
  0x73   : > { %v264_v6 = vmul.f32 %v558_v5, %v263_v4  ;;  %v274_v7 = vadd.f32 %v558_v5, %v263_v4 }
  0x75   : > { %265 = vadd.xlane.f32.xlu0 %v264_v6 }
  0x79   : > { %275 = vadd.xlane.f32.xlu0 %v274_v7 }
 0x102   : > { %v266_v8 = vpop.xlane.xlu0 %265 }
 0x103   : > { %v267_v9 = vrot.slane %v266_v8, 4 }
 0x105   : > { %v268_v10 = vadd.f32 %v267_v9, %v266_v8 }
 0x106   : > { %v276_v11 = vpop.xlane.xlu0 %275 }
 0x107   : > { %v269_v12 = vrot.slane %v268_v10, 2  ;;  %v277_v13 = vrot.slane %v276_v11, 4 }
 0x109   : > { %v278_v14 = vadd.f32 %v277_v13, %v276_v11  ;;  %v270_v15 = vadd.f32 %v269_v12, %v268_v10 }
 0x10b   : > { %v279_v16 = vrot.slane %v278_v14, 2  ;;  %v271_v17 = vrot.slane %v270_v15, 1 }
 0x10d   : > { %v280_v18 = vadd.f32 %v279_v16, %v278_v14  ;;  %v272_v19 = vadd.f32 %v271_v17, %v270_v15 }
 0x10f   : > { %479 = vpush %v272_v19  ;;  %v281_v20 = vrot.slane %v280_v18, 1 }
 0x111   : > { %v282_v21 = vadd.f32 %v281_v20, %v280_v18 }
 0x113   : > { %481 = vpush %v282_v21 }
 0x140   : > { %s480_s29 = spop %479 }
 0x141   : > { %v284_v22 = vstv %s480_s29 }
 0x142   : > { %285 = vst [vmem:[%s248_s22] sm:$0xff] %v284_v22 }
 0x143   : > { %632 = shalt.err (!%p629_p2)
}
 0x144   : > { %s633_s11 = scalar_lea.hbm %s944_s28, 128  ;;  %s637_s18 = scalar_lea.hbm %s1028_s2, 256 }
 0x145   : > { %p634_p9 = scmp.ne.s32.totalorder %s944_s28, %s633_s11  ;;  %p638_p6 = scmp.lt.u32.totalorder %s944_s28, %s1028_s2 }
 0x146   : > { %p639_p13 = scmp.lt.u32.totalorder %s637_s18, %s633_s11  ;;  %p641_p0 = scmp.lt.u32.totalorder %s633_s11, %s944_s28 }
 0x147   : > { %p635_p11 = pnand %p634_p9, %p1042_p5 }
 0x148   : > { %p640_p8 = por %p639_p13, %p638_p6 }
 0x149   : > { %p636_p3 = pneg %p635_p11 }
 0x14a   : > { %p642_p7 = por %p641_p0, %p640_p8 }
 0x14c   : > { %p643_p4 = pnand %p642_p7, %p636_p3 }
 0x14e   : > { %646 = shalt.err (!%p643_p4)
}
 0x14f   : > { %487 = dma.vmem_to_hbm [thread:$0]  (%p1042_p5), %s946_s4, 128, %s944_s28, %s289_s19  }
 0x150   : > { %s482_s21 = spop %481  ;;  %s977_s11 = scalar_lea.hbm %s1029_s3, %s475_s24 }
 0x151   : > { %v286_v23 = vstv %s482_s21  ;;  %s294_s22 = scalar_lea.sflag [#allocation9], %s917_s23  ;;  %s647_s7 = scalar_lea.vmem %s948_s30, 128 }
 0x152   : > { %287 = vst [vmem:[%s255_s6] sm:$0xff] %v286_v23  ;;  %p648_p10 = scmp.ne.s32.totalorder %s948_s30, %s647_s7  ;;  %s742_s18 = smov [#allocation8]  }
 0x153   : > { %s651_s29 = sshll.u32 %s742_s18, 4  ;;  %s652_s29 = int_to_ptr.vmem [resolvable:$false] %s651_s29 }
 0x154   : > { %p649_p12 = pnand %p648_p10, %p1042_p5  ;;  %s653_s4 = scalar_lea.vmem %s652_s29, 256 }
 0x155   : > { %p654_p2 = scmp.lt.s32.totalorder %s948_s30, %s652_s29  ;;  %p655_p9 = scmp.lt.s32.totalorder %s653_s4, %s647_s7 }
 0x156   : > { %p650_p1 = pneg %p649_p12 }
 0x157   : > { %p656_p11 = por %p655_p9, %p654_p2 }
 0x159   : > { %p657_p3 = pnand %p656_p11, %p650_p1 }
 0x15b   : > { %660 = shalt.err (!%p657_p3)
}
 0x15c   : > { %s661_s15 = scalar_lea.hbm %s977_s11, 128  ;;  %s665_s24 = scalar_lea.hbm %s1029_s3, 256 }
 0x15d   : > { %p662_p6 = scmp.ne.s32.totalorder %s977_s11, %s661_s15  ;;  %p666_p0 = scmp.lt.u32.totalorder %s977_s11, %s1029_s3 }
 0x15e   : > { %p667_p7 = scmp.lt.u32.totalorder %s665_s24, %s661_s15  ;;  %p669_p10 = scmp.lt.u32.totalorder %s661_s15, %s977_s11 }
 0x15f   : > { %p663_p13 = pnand %p662_p6, %p1042_p5 }
 0x160   : > { %p668_p4 = por %p667_p7, %p666_p0 }
 0x161   : > { %p664_p8 = pneg %p663_p13 }
 0x162   : > { %p670_p12 = por %p669_p10, %p668_p4 }
 0x164   : > { %p671_p1 = pnand %p670_p12, %p664_p8 }
 0x166   : > { %674 = shalt.err (!%p671_p1)
}
 0x167   : > { %488 = dma.vmem_to_hbm [thread:$0]  (%p1042_p5), %s948_s30, 128, %s977_s11, %s294_s22  }
 0x168 PF: > { %s334_s19 = sand.u32 1, %s717_s12   ;;  %p1043_p2 = scmp.ne.s32.totalorder %s1035_s27, 0 }
 0x169   : > { %p1044_p9 = scmp.ge.s32.totalorder %s737_s17, 2  ;;  %s335_s10 = scalar_lea.sflag [#allocation4], %s334_s19 }
 0x16b   : > { %p499_p11 = pnand %p1044_p9, %p1043_p2 }
 0x16d   : > { %708 = dma.done.wait (!%p499_p11), %s335_s10, 128  }
 0x16e   : > { %710 = vsyncadd (!%p499_p11), %s335_s10, 4294967168  ;;  %s344_s21 = scalar_lea.sflag [#allocation9], %s334_s19 }
 0x16f   : > { %712 = dma.done.wait (!%p499_p11), %s344_s21, 128  }
 0x170   : > { %714 = vsyncadd (!%p499_p11), %s344_s21, 4294967168  ;;  %s26_s17 = sadd.s32 1, %s737_s17   ;;  %s1045_s12 = smov %s721_s13 }
 0x171   : > { %p23_p3 = scmp.ge.s32.totalorder %s26_s17, 4   ;;  %s1046_s13 = smov %s725_s14 }
 0x172   : > { %s1047_s14 = smov %s819_s26  ;;  %s1048_s15 = smov %s733_s16 }
 0x173   : > { %s1049_s16 = smov %s1051_s20  ;;  %25 = sbr.rel (!%p23_p3) target bundleno = 10 (0xa), region = 103 }
 0x17a   :  { %349 = vsyncpa [#allocation3], 1 }
 0x17b   :  { %351 = vsyncpa [#allocation3 + $0x1], 1 }
 0x17c   :  { %352 = vsyncpa [#allocation6], 1 }
 0x17d   :  { %354 = vsyncpa [#allocation6 + $0x1], 1 }
 0x17e   :  { %355 = vsyncpa [#allocation4], 1 }
 0x17f   :  { %357 = vsyncpa [#allocation4 + $0x1], 1 }
 0x180   :  { %358 = vsyncpa [#allocation9], 1 }
 0x181   :  { %360 = vsyncpa [#allocation9 + $0x1], 1 }

</bundles_post_ra>
